<compile_context>
chip_gen: v7x
topology: tpu7x:2x2x1
jax: 0.10.0
libtpu: 0.0.40
codegen_flags: <defaults>
</compile_context>

<pallas_src>
import jax
import jax.numpy as jnp
from jax.experimental import pallas as pl
from jax.experimental.pallas import tpu as pltpu


def _additive_attn_kernel(h_ref, wvt_ref, bv_ref, qcol_ref, o_ref):
    # h_ref    : (Bt, S, E)   Bt batch elements of the sequence
    # wvt_ref  : (E, A_pad)   lin_vw.weight, transposed + zero-padded on A
    # bv_ref   : (1, A_pad)   lin_vw.bias, zero-padded on A
    # qcol_ref : (A_pad, 1)   lin_q.weight as a column, zero-padded on A
    # o_ref    : (1, Bt, E)   pooled outputs for this block of batch elements
    bt, s, e = h_ref.shape

    h = h_ref[...].astype(jnp.float32)                       # (Bt, S, E)
    wvt = wvt_ref[...]                                       # (E, A_pad)
    h_mat = h.reshape(bt * s, e).astype(wvt.dtype)           # (Bt*S, E)

    # tmp = tanh(h @ W_vw^T + b_vw)  -> one big MXU matmul for the whole block
    tmp = jnp.tanh(
        jnp.dot(h_mat, wvt, preferred_element_type=jnp.float32)
        + bv_ref[...].astype(jnp.float32)
    )                                                        # (Bt*S, A_pad) f32

    # aw_logits = tmp @ W_q^T  -> MXU contraction over A (padded lanes are 0)
    scores = jnp.dot(tmp, qcol_ref[...].astype(jnp.float32),
                     preferred_element_type=jnp.float32)     # (Bt*S, 1)
    scores = scores.reshape(bt, s, 1)                        # split leading dim only

    # softmax over the sequence axis S, independently per batch element
    m = jnp.max(scores, axis=1, keepdims=True)               # (Bt, 1, 1)
    ex = jnp.exp(scores - m)                                 # (Bt, S, 1)
    denom = jnp.sum(ex, axis=1, keepdims=True)               # (Bt, 1, 1)
    aw = ex * pl.reciprocal(denom, approx=True)              # (Bt, S, 1)

    # r = aw^T @ h  -> (Bt, E), pooled in f32
    r = jnp.sum(aw * h, axis=1)                              # (Bt, E)
    o_ref[0] = r.astype(o_ref.dtype)


def _choose_block_b(B, S, target_rows=256):
    """Pick Bt so Bt*S ~ target MXU M rows, keeping >=2 grid steps if B allows."""
    bt = max(1, target_rows // max(S, 1))
    bt = min(bt, B)
    # v7x has 2 TensorCores/chip: keep at least 2 parallel grid steps.
    if B >= 2 and -(-B // bt) < 2:
        bt = -(-B // 2)
    return max(1, bt)


def additive_word_attention(h, w_vw, b_vw, w_q, *, matmul_dtype=jnp.float32):
    """h: (B, S, E); w_vw: (A, E); b_vw: (A,); w_q: (1, A) -> (B, 1, E).

    matmul_dtype=jnp.bfloat16 is a v6e/v7x-only speed knob (keep f32 on v5e).
    """
    B, S, E = h.shape
    A = w_vw.shape[0]
    out_dtype = h.dtype

    # --- host-side weight prep: transpose + zero-pad A to a lane multiple ---
    A_pad = max(128, ((A + 127) // 128) * 128)
    if A_pad != A:
        w_vw = jnp.pad(w_vw, ((0, A_pad - A), (0, 0)))
        b_vw = jnp.pad(b_vw, ((0, A_pad - A),))
        w_q = jnp.pad(w_q, ((0, 0), (0, A_pad - A)))
    wvt = jnp.transpose(w_vw).astype(matmul_dtype)       # (E, A_pad)
    bv = b_vw.reshape(1, A_pad).astype(jnp.float32)      # (1, A_pad)
    qcol = w_q.reshape(A_pad, 1).astype(jnp.float32)     # (A_pad, 1)

    # --- batch blocking: Bt elements per grid step, pad B if needed ---------
    bt = _choose_block_b(B, S)
    nb = -(-B // bt)
    B_pad = nb * bt
    if B_pad != B:
        h = jnp.pad(h, ((0, B_pad - B), (0, 0), (0, 0)))

    out = pl.pallas_call(
        _additive_attn_kernel,
        out_shape=jax.ShapeDtypeStruct((nb, bt, E), out_dtype),
        grid_spec=pl.GridSpec(
            grid=(nb,),
            in_specs=[
                pl.BlockSpec((bt, S, E), lambda i: (i, 0, 0)),
                pl.BlockSpec((E, A_pad), lambda i: (0, 0)),
                pl.BlockSpec((1, A_pad), lambda i: (0, 0)),
                pl.BlockSpec((A_pad, 1), lambda i: (0, 0)),
            ],
            out_specs=pl.BlockSpec((1, bt, E), lambda i: (i, 0, 0)),
        ),
        compiler_params=pltpu.CompilerParams(
            dimension_semantics=("parallel",)),
    )(h, wvt, bv, qcol)

    # (nb, Bt, E) -> (B, 1, E), dropping any batch padding.
    return out.reshape(B_pad, E)[:B].reshape(B, 1, E)


def _reference(h, w_vw, b_vw, w_q):
    hp = jax.lax.Precision.HIGHEST
    tmp = jnp.tanh(jnp.einsum("bse,ae->bsa", h, w_vw, precision=hp) + b_vw)
    aw = jnp.einsum("bsa,oa->bso", tmp, w_q, precision=hp)   # (B, S, 1)
    aw = jax.nn.softmax(aw, axis=1)
    return jnp.einsum("bso,bse->boe", aw, h, precision=hp)   # (B, 1, E)


if __name__ == "__main__":
    B, S, E, A = 2, 8, 32, 200   # embedding_dimension=32, additive_vector_dim=200

    key = jax.random.PRNGKey(0)
    k_h, k_w, k_b, k_q = jax.random.split(key, 4)

    h = jax.random.normal(k_h, (B, S, E), dtype=jnp.float32)
    # nn.Linear-style deterministic init (uniform +/- 1/sqrt(fan_in))
    w_vw = (jax.random.uniform(k_w, (A, E), minval=-1.0, maxval=1.0)
            / jnp.sqrt(E)).astype(jnp.float32)
    b_vw = (jax.random.uniform(k_b, (A,), minval=-1.0, maxval=1.0)
            / jnp.sqrt(E)).astype(jnp.float32)
    w_q = (jax.random.uniform(k_q, (1, A), minval=-1.0, maxval=1.0)
           / jnp.sqrt(A)).astype(jnp.float32)

    out = jax.block_until_ready(additive_word_attention(h, w_vw, b_vw, w_q))

    ref = _reference(h, w_vw, b_vw, w_q)
    assert out.shape == (B, 1, E)
    # Tolerance loosened slightly vs 1e-5 because the softmax denominator uses
    # the EUP approximate reciprocal (relative error ~2^-12).
    assert jnp.allclose(out, ref, atol=2e-3, rtol=2e-3), "mismatch vs reference"
    print("KERNEL_OK")
</pallas_src>

<mosaic_0001>
module attributes {stable_mosaic.version = 11 : i64} {
  func.func @_additive_attn_kernel(%arg0: i32, %arg1: memref<1x8x32xf32, #tpu.memory_space<vmem>>, %arg2: memref<32x256xf32, #tpu.memory_space<vmem>>, %arg3: memref<1x256xf32, #tpu.memory_space<vmem>>, %arg4: memref<256x1xf32, #tpu.memory_space<vmem>>, %arg5: memref<1x1x32xf32, #tpu.memory_space<vmem>>) attributes {dimension_semantics = [#tpu.dimension_semantics<parallel>], iteration_bounds = array<i64: 2>, scalar_prefetch = 0 : i64, scratch_operands = 0 : i64, tpu.core_type = #tpu.core_type<tc>, window_params = [{transform_indices = @transform_0, window_bounds = array<i64: 1, 8, 32>}, {pipeline_mode = #tpu.pipeline_mode<synchronous>, transform_indices = @transform_1, window_bounds = array<i64: 32, 256>}, {pipeline_mode = #tpu.pipeline_mode<synchronous>, transform_indices = @transform_2, window_bounds = array<i64: 1, 256>}, {pipeline_mode = #tpu.pipeline_mode<synchronous>, transform_indices = @transform_3, window_bounds = array<i64: 256, 1>}, {transform_indices = @transform_4, window_bounds = array<i64: 1, 1, 32>}]} {
    %c0 = arith.constant 0 : index
    %c0_0 = arith.constant 0 : index
    %c0_1 = arith.constant 0 : index
    %0 = vector.load %arg1[%c0, %c0_0, %c0_1] : memref<1x8x32xf32, #tpu.memory_space<vmem>>, vector<1x8x32xf32>
    %c0_2 = arith.constant 0 : index
    %c0_3 = arith.constant 0 : index
    %1 = vector.load %arg2[%c0_2, %c0_3] : memref<32x256xf32, #tpu.memory_space<vmem>>, vector<32x256xf32>
    %2 = vector.shape_cast %0 : vector<1x8x32xf32> to vector<8x32xf32>
    %cst = arith.constant dense<0.000000e+00> : vector<8x256xf32>
    %3 = tpu.matmul %2, %1, %cst {dimension_numbers = #tpu.dot_dimension_numbers<[1], [0], [0], [1], [0, 0, 1, 1], [], []>} : vector<8x32xf32>, vector<32x256xf32>, vector<8x256xf32> -> vector<8x256xf32>
    %c0_4 = arith.constant 0 : index
    %c0_5 = arith.constant 0 : index
    %4 = vector.load %arg3[%c0_4, %c0_5] : memref<1x256xf32, #tpu.memory_space<vmem>>, vector<1x256xf32>
    %5 = vector.broadcast %4 : vector<1x256xf32> to vector<8x256xf32>
    %6 = arith.addf %3, %5 : vector<8x256xf32>
    %7 = math.tanh %6 : vector<8x256xf32>
    %c0_6 = arith.constant 0 : index
    %c0_7 = arith.constant 0 : index
    %8 = vector.load %arg4[%c0_6, %c0_7] : memref<256x1xf32, #tpu.memory_space<vmem>>, vector<256x1xf32>
    %cst_8 = arith.constant dense<0.000000e+00> : vector<8x1xf32>
    %9 = tpu.matmul %7, %8, %cst_8 {dimension_numbers = #tpu.dot_dimension_numbers<[1], [0], [0], [1], [0, 0, 1, 1], [], []>} : vector<8x256xf32>, vector<256x1xf32>, vector<8x1xf32> -> vector<8x1xf32>
    %10 = vector.shape_cast %9 : vector<8x1xf32> to vector<1x8x1xf32>
    %cst_9 = arith.constant dense<0xFF800000> : vector<1x1xf32>
    %11 = vector.multi_reduction <maximumf>, %10, %cst_9 [1] : vector<1x8x1xf32> to vector<1x1xf32>
    %12 = vector.shape_cast %11 : vector<1x1xf32> to vector<1x1x1xf32>
    %13 = vector.broadcast %12 : vector<1x1x1xf32> to vector<1x8x1xf32>
    %14 = arith.subf %10, %13 : vector<1x8x1xf32>
    %15 = math.exp %14 : vector<1x8x1xf32>
    %cst_10 = arith.constant dense<0.000000e+00> : vector<1x1xf32>
    %16 = vector.multi_reduction <add>, %15, %cst_10 [1] : vector<1x8x1xf32> to vector<1x1xf32>
    %17 = vector.shape_cast %16 : vector<1x1xf32> to vector<1x1x1xf32>
    %18 = tpu.reciprocal %17 {approx = true} : vector<1x1x1xf32> -> vector<1x1x1xf32>
    %19 = vector.broadcast %18 : vector<1x1x1xf32> to vector<1x8x1xf32>
    %20 = arith.mulf %15, %19 : vector<1x8x1xf32>
    %21 = vector.broadcast %20 : vector<1x8x1xf32> to vector<1x8x32xf32>
    %22 = arith.mulf %21, %0 : vector<1x8x32xf32>
    %cst_11 = arith.constant dense<0.000000e+00> : vector<1x32xf32>
    %23 = vector.multi_reduction <add>, %22, %cst_11 [1] : vector<1x8x32xf32> to vector<1x32xf32>
    %c0_12 = arith.constant 0 : index
    %c0_13 = arith.constant 0 : index
    %c0_14 = arith.constant 0 : index
    %24 = vector.load %arg5[%c0_12, %c0_13, %c0_14] : memref<1x1x32xf32, #tpu.memory_space<vmem>>, vector<1x1x32xf32>
    %25 = vector.shape_cast %24 : vector<1x1x32xf32> to vector<1x32xf32>
    %26 = vector.shape_cast %23 : vector<1x32xf32> to vector<1x1x32xf32>
    tpu.vector_store %arg5[%c0_12, %c0_13, %c0_14], %26 {strides = array<i32>} : memref<1x1x32xf32, #tpu.memory_space<vmem>>, vector<1x1x32xf32>,
    return
  }
  func.func @transform_0(%arg0: i32) -> (i32, i32, i32) {
    %c0_i32 = arith.constant 0 : i32
    %c0_i32_0 = arith.constant 0 : i32
    %c0_i32_1 = arith.constant 0 : i32
    return %arg0, %c0_i32, %c0_i32_0 : i32, i32, i32
  }
  func.func @transform_1(%arg0: i32) -> (i32, i32) {
    %c0_i32 = arith.constant 0 : i32
    %c0_i32_0 = arith.constant 0 : i32
    %c0_i32_1 = arith.constant 0 : i32
    return %c0_i32, %c0_i32_0 : i32, i32
  }
  func.func @transform_2(%arg0: i32) -> (i32, i32) {
    %c0_i32 = arith.constant 0 : i32
    %c0_i32_0 = arith.constant 0 : i32
    %c0_i32_1 = arith.constant 0 : i32
    return %c0_i32, %c0_i32_0 : i32, i32
  }
  func.func @transform_3(%arg0: i32) -> (i32, i32) {
    %c0_i32 = arith.constant 0 : i32
    %c0_i32_0 = arith.constant 0 : i32
    %c0_i32_1 = arith.constant 0 : i32
    return %c0_i32, %c0_i32_0 : i32, i32
  }
  func.func @transform_4(%arg0: i32) -> (i32, i32, i32) {
    %c0_i32 = arith.constant 0 : i32
    %c0_i32_0 = arith.constant 0 : i32
    %c0_i32_1 = arith.constant 0 : i32
    return %arg0, %c0_i32, %c0_i32_0 : i32, i32, i32
  }
}

</mosaic_0001>

<bundles_post_ra>
// kernel: tpu_custom_call.1
= control target key start
LH: loop header
LB: loop body
LE: loop exit
PB: predicated region body
PF: predicated region fallthrough
CT: control target
= control target key end

     0   :  { %9 = vsyncpa [#allocation3], 0  ;;  %s950_s0 = inlined_call_operand.vmem [shape: f32[2,8,32], index: 0, kind: input, shape index: {}]   ;;  %s951_s1 = inlined_call_operand.vmem [shape: f32[32,256], index: 1, kind: input, shape index: {}]   ;;  %s952_s2 = inlined_call_operand.vmem [shape: f32[1,256], index: 2, kind: input, shape index: {}]   ;;  %s953_s3 = inlined_call_operand.vmem [shape: f32[256,1], index: 3, kind: input, shape index: {}]   ;;  %s954_s4 = inlined_call_operand.hbm [shape: f32[2,1,32], index: 4, kind: output, shape index: {}]  }
   0x1   :  { %11 = vsyncpa [#allocation3 + $0x1], 0  ;;  %s721_s15 = smov 0   ;;  %s723_s16 = smov 0  }
   0x2   :  { %s725_s17 = smov 0   ;;  %s727_s18 = smov 0  }
   0x3 LB: > { %s742_s19 = sadd.s32 4294967295, %s691_s18   ;;  %s495_s20 = sadd.s32 4294967294, %s691_s18   ;;  %s691_s18 = sphi %s727_s18, %s960_s18   ;;  %s687_s17 = sphi %s725_s17, %s959_s17   ;;  %s683_s16 = sphi %s723_s16, %s958_s16   ;;  %s679_s15 = sphi %s721_s15, %s957_s15  }
   0x4   : > { %s746_s21 = sadd.s32 1, %s691_s18   ;;  %s113_s22 = sadd.s32 1, %s687_s17 }
   0x5   : > { %s110_s23 = ssub.s32 %s691_s18, %s746_s21  ;;  %p123_p0 = scmp.ne.s32.totalorder %s687_s17, %s683_s16 }
   0x6   : > { %p111_p1 = scmp.eq.s32.totalorder %s110_s23, 0  ;;  %p124_p2 = scmp.eq.s32.totalorder %s742_s19, 1 }
   0x7   : > { %p129_p3 = scmp.ne.s32.totalorder %s683_s16, %s679_s15  ;;  %p130_p4 = scmp.eq.s32.totalorder %s495_s20, 1 }
   0x8   : > { %s757_s24 = scalar_select %p111_p1, %s687_s17, %s113_s22  }
   0x9   : > { %p759_p5 = por %p124_p2, %p123_p0  ;;  %p763_p6 = por %p130_p4, %p129_p3 }
   0xa   : > { %p498_p7 = scmp.ge.s32.totalorder %s691_s18, 1  ;;  %p164_p8 = scmp.lt.s32.totalorder %s691_s18, 3 }
   0xc   : > { %p165_p9 = pnand %p498_p7, %p164_p8 }
   0xd   : > { %v194_v0 = vld [vmem:[%s951_s1 + $0x8] sm:$0xff] (!%p165_p9)  ;;  %v196_v1 = vld [vmem:[%s951_s1 + $0x18] sm:$0xff] (!%p165_p9)  ;;  %v193_v2 = vld [vmem:[%s951_s1] sm:$0xff] (!%p165_p9)  ;;  %p188_p10 = scmp.lt.s32.totalorder (!%p165_p9), %s742_s19, 1  ;;  %v693_v7 = vmov (!%p165_p9), 0.0   ;;  %vm213_vm0 = vcmask (!%p165_p9), 261120   ;;  %v203_v62 = vlaneseq (!%p165_p9) }
   0xe   : > { %168 = sbr.rel (%p165_p9) target bundleno = 679 (0x2a7), region = 36  ;;  %v539_v3 = vpack.c.bf16 (!%p165_p9), %v196_v1, %v194_v0  ;;  %v195_v4 = vld [vmem:[%s951_s1 + $0x10] sm:$0xff] (!%p165_p9)  ;;  %v198_v5 = vld [vmem:[%s951_s1 + $0x28] sm:$0xff] (!%p165_p9)  ;;  %v200_v6 = vld [vmem:[%s951_s1 + $0x38] sm:$0xff] (!%p165_p9)  ;;  %281 = vmatprep.mubr.f32.mxu0 (!%p165_p9), %v693_v7  ;;  %vm392_vm1 = vcmask (!%p165_p9), 7168   ;;  %s186_s29 = sand.u32 (!%p165_p9), 1, %s683_s16  }
   0xf   : > { %v541_v8 = vpack.c.bf16 (!%p165_p9), %v195_v4, %v193_v2  ;;  %v543_v9 = vpack.c.bf16 (!%p165_p9), %v200_v6, %v198_v5  ;;  %v197_v10 = vld [vmem:[%s951_s1 + $0x20] sm:$0xff] (!%p165_p9)  ;;  %v199_v11 = vld [vmem:[%s951_s1 + $0x30] sm:$0xff] (!%p165_p9)  ;;  %v307_v13 = vld [vmem:[%s953_s3 + $0x88] sm:$0xff] (!%p165_p9)  ;;  %v204_v63 = vshrl.u32 (!%p165_p9), %v203_v62, 7  ;;  %s501_s30 = sshll.u32 (!%p165_p9), %s742_s19, 4  ;;  %s187_s5 = scalar_lea.vmem (!%p165_p9), [#allocation2], %s186_s29 }
  0x10   : > { %v306_v12 = vld [vmem:[%s953_s3 + $0x80] sm:$0xff] (!%p165_p9)  ;;  %540 = vmatprep.subr.bf16.mxu0 (!%p165_p9), %v539_v3  ;;  %v291_v15 = vld [vmem:[%s953_s3 + $0x8] sm:$0xff] (!%p165_p9)  ;;  %v545_v16 = vpack.c.bf16 (!%p165_p9), %v199_v11, %v197_v10  ;;  %v308_v19 = vld [vmem:[%s953_s3 + $0x90] sm:$0xff] (!%p165_p9)  ;;  %v694_v11 = vmov (!%p165_p9), 0   ;;  %s440_s6 = sshll.u32 (!%p165_p9), %s187_s5, 4  ;;  %vm425_vm2 = vcmask (!%p165_p9), 253952   ;;  %s910_s6 = int_to_ptr.vmem [resolvable:$true] %s440_s6 }
  0x11   : > { %v290_v14 = vld [vmem:[%s953_s3] sm:$0xff] (!%p165_p9)  ;;  %542 = vmatpush1.bf16.msra.mxu0 (!%p165_p9), %v541_v8  ;;  %v547_v17 = vpack.c.bf16 (!%p165_p9), %v307_v13, %v306_v12  ;;  %v309_v20 = vld [vmem:[%s953_s3 + $0x98] sm:$0xff] (!%p165_p9)  ;;  %v292_v21 = vld [vmem:[%s953_s3 + $0x10] sm:$0xff] (!%p165_p9)  ;;  %v205_v0 = vsub.s32 (!%p165_p9), 0, %v204_v63  ;;  %v209_v2 = vsub.s32 (!%p165_p9), 1, %v204_v63  ;;  %620 = vset.pattern.permute.xlu0 (!%p165_p9), %v694_v11  ;;  %s428_s10 = scalar_lea.sflag (!%p165_p9), [#allocation3], %s186_s29 }
  0x12   : > { %v549_v18 = vpack.c.bf16 (!%p165_p9), %v291_v15, %v290_v14  ;;  %544 = vmatprep.subr.bf16.mxu0 (!%p165_p9), %v543_v9  ;;  %v551_v22 = vpack.c.bf16 (!%p165_p9), %v309_v20, %v308_v19  ;;  %v293_v23 = vld [vmem:[%s953_s3 + $0x18] sm:$0xff] (!%p165_p9)  ;;  %v310_v24 = vld [vmem:[%s953_s3 + $0xa0] sm:$0xff] (!%p165_p9)  ;;  %v311_v25 = vld [vmem:[%s953_s3 + $0xa8] sm:$0xff] (!%p165_p9)  ;;  %s629_s11 = scalar_lea.vmem (!%p165_p9), %s910_s6, 16 }
  0x13   : > { %548 = vmatprep.subr.bf16.mxu1 (!%p165_p9), %v547_v17  ;;  %v553_v26 = vpack.c.bf16 (!%p165_p9), %v293_v23, %v292_v21  ;;  %v555_v28 = vpack.c.bf16 (!%p165_p9), %v311_v25, %v310_v24  ;;  %v294_v29 = vld [vmem:[%s953_s3 + $0x20] sm:$0xff] (!%p165_p9)  ;;  %v295_v30 = vld [vmem:[%s953_s3 + $0x28] sm:$0xff] (!%p165_p9)  ;;  %v312_v31 = vld [vmem:[%s953_s3 + $0xb0] sm:$0xff] (!%p165_p9)  ;;  %p630_p11 = scmp.ne.s32.totalorder (!%p165_p9), %s910_s6, %s629_s11 }
  0x14   : > { %550 = vmatpush3.bf16.msra.mxu1 (!%p165_p9), %v549_v18  ;;  %v313_v32 = vld [vmem:[%s953_s3 + $0xb8] sm:$0xff] (!%p165_p9)  ;;  %v557_v33 = vpack.c.bf16 (!%p165_p9), %v295_v30, %v294_v29  ;;  %v296_v35 = vld [vmem:[%s953_s3 + $0x30] sm:$0xff] (!%p165_p9)  ;;  %v314_v38 = vld [vmem:[%s953_s3 + $0xc0] sm:$0xff] (!%p165_p9) }
  0x15   : > { %s189_s23 = scalar_select %p188_p10, %s742_s19, 1  ;;  %546 = vmatpush1.bf16.msra.mxu0 %v545_v16  ;;  %552 = vmatprep.subr.bf16.mxu1 %v551_v22  ;;  %v559_v34 = vpack.c.bf16 %v313_v32, %v312_v31  ;;  %v297_v36 = vld [vmem:[%s953_s3 + $0x38] sm:$0xff]  ;;  %v315_v39 = vld [vmem:[%s953_s3 + $0xc8] sm:$0xff]  ;;  %v298_v41 = vld [vmem:[%s953_s3 + $0x40] sm:$0xff] }
  0x16   : > { %v561_v37 = vpack.c.bf16 %v297_v36, %v296_v35  ;;  %v563_v40 = vpack.c.bf16 %v315_v39, %v314_v38  ;;  %v299_v42 = vld [vmem:[%s953_s3 + $0x48] sm:$0xff]  ;;  %v316_v44 = vld [vmem:[%s953_s3 + $0xd0] sm:$0xff]  ;;  %v317_v45 = vld [vmem:[%s953_s3 + $0xd8] sm:$0xff]  ;;  %p631_p12 = pnand %p630_p11, %p759_p5  ;;  %s695_s19 = smov [#allocation2]  }
  0x17   : > { %s499_s9 = sshll.u32 %s189_s23, 3  ;;  %v565_v43 = vpack.c.bf16 %v299_v42, %v298_v41  ;;  %v567_v46 = vpack.c.bf16 %v317_v45, %v316_v44  ;;  %v300_v47 = vld [vmem:[%s953_s3 + $0x50] sm:$0xff]  ;;  %v301_v48 = vld [vmem:[%s953_s3 + $0x58] sm:$0xff]  ;;  %v318_v50 = vld [vmem:[%s953_s3 + $0xe0] sm:$0xff]  ;;  %s633_s12 = sshll.u32 %s695_s19, 4  ;;  %s634_s12 = int_to_ptr.vmem [resolvable:$false] %s633_s12 }
  0x18   : > { %s191_s28 = scalar_lea.vmem %s950_s0, %s499_s9  ;;  %554 = vmatpush3.bf16.msra.mxu1 %v553_v26  ;;  %v569_v49 = vpack.c.bf16 %v301_v48, %v300_v47  ;;  %v319_v51 = vld [vmem:[%s953_s3 + $0xe8] sm:$0xff]  ;;  %v302_v52 = vld [vmem:[%s953_s3 + $0x60] sm:$0xff]  ;;  %v320_v55 = vld [vmem:[%s953_s3 + $0xf0] sm:$0xff]  ;;  %s908_s9 = scalar_lea.hbm %s954_s4, %s501_s30 }
  0x19   : > { %v828_v27 = vld [vmem:[%s191_s28] sm:$0xff]  ;;  %556 = vmatprep.subr.bf16.mxu1 %v555_v28  ;;  %v571_v53 = vpack.c.bf16 %v319_v51, %v318_v50  ;;  %v303_v54 = vld [vmem:[%s953_s3 + $0x68] sm:$0xff]  ;;  %v321_v56 = vld [vmem:[%s953_s3 + $0xf8] sm:$0xff]  ;;  %p632_p13 = pneg %p631_p12  ;;  %s635_s13 = scalar_lea.vmem %s634_s12, 32 }
  0x1a   : > { %500 = vmatmul.mubr.msk.f32.vlgmr.msra.gmra.mrb[0].mxu0 %vm213_vm0, %v828_v27  ;;  %v573_v57 = vpack.c.bf16 %v303_v54, %v302_v52  ;;  %v575_v58 = vpack.c.bf16 %v321_v56, %v320_v55  ;;  %v304_v59 = vld [vmem:[%s953_s3 + $0x70] sm:$0xff]  ;;  %v305_v60 = vld [vmem:[%s953_s3 + $0x78] sm:$0xff]  ;;  %v201_v1 = vld [vmem:[%s952_s2] sm:$0x3]  ;;  %p636_p0 = scmp.lt.s32.totalorder %s910_s6, %s634_s12  ;;  %p637_p1 = scmp.lt.s32.totalorder %s635_s13, %s629_s11 }
  0x1b   : > { %v577_v61 = vpack.c.bf16 %v305_v60, %v304_v59  ;;  %v206_v3 = vrot.slane %v201_v1, %v205_v0  ;;  %v210_v4 = vrot.slane %v201_v1, %v209_v2 }
  0x1c   : > { %558 = vmatpush3.bf16.msra.mxu1 %v557_v33  ;;  %p638_p2 = por %p637_p1, %p636_p0 }
  0x1d   : > { %560 = vmatprep.subr.bf16.mxu1 %v559_v34 }
  0x1e   : > { %p639_p3 = pnand %p638_p2, %p632_p13 }
  0x20   : > { %562 = vmatpush3.bf16.msra.mxu1 %v561_v37 }
  0x21   : > { %564 = vmatprep.subr.bf16.mxu1 %v563_v40 }
  0x24   : > { %566 = vmatpush3.bf16.msra.mxu1 %v565_v43 }
  0x25   : > { %568 = vmatprep.subr.bf16.mxu1 %v567_v46 }
  0x28   : > { %570 = vmatpush3.bf16.msra.mxu1 %v569_v49 }
  0x29   : > { %572 = vmatprep.subr.bf16.mxu1 %v571_v53 }
  0x2c   : > { %574 = vmatpush3.bf16.msra.mxu1 %v573_v57 }
  0x2d   : > { %576 = vmatprep.subr.bf16.mxu1 %v575_v58 }
  0x30   : > { %578 = vmatpush3.bf16.msra.mxu1 %v577_v61 }
  0xed   : > { %v283_v5 = vpop.f32.mrb[0].mxu0 }
  0xee   : > { %v284_v6 = vadd.f32 %v283_v5, %v206_v3  ;;  %v285_v7 = vpop.f32.mrb[1].mxu0 }
  0xef   : > { %v286_v8 = vadd.f32 %v285_v7, %v210_v4 }
  0xf1   : > { %621 = vtanh.f32 %v286_v8 }
  0xf2   : > { %623 = vtanh.f32 %v284_v6 }
  0xfb   : > { %v622_v9 = vpop.eup %621 }
  0xfc   : > { %v624_v10 = vpop.eup %623  ;;  %386 = vmatprep.mubr.f32.mxu1 %v622_v9 }
  0xfd   : > { %387 = vmatmul.mubr.f32.vlgmr.msra.gmra.mrb[0].mxu1 %v624_v10 }
 0x1d0   : > { %v536_v12 = vpop.f32.mrb[0].mxu1 }
 0x1d1   : > { %v537_v13 = vpop.f32.mrb[1].mxu1 }
 0x1d2   : > { %v538_v14 = vadd.f32 %v537_v13, %v536_v12 }
 0x1d4   : > { %v393_v15 = vsel %vm392_vm1, %v538_v14, -inf }
 0x1d5   : > { %v394_v16 = vrot.slane %v393_v15, 4 }
 0x1d7   : > { %v395_v17 = vmax.f32 %v393_v15, %v394_v16 }
 0x1d9   : > { %v396_v18 = vrot.slane %v395_v17, 2 }
 0x1db   : > { %v397_v19 = vmax.f32 %v395_v17, %v396_v18 }
 0x1dd   : > { %v398_v20 = vrot.slane %v397_v19, 1 }
 0x1df   : > { %v399_v21 = vmax.f32 %v397_v19, %v398_v20 }
 0x1e1   : > { %v400_v22 = vsub.f32 %v538_v14, %v399_v21 }
 0x1e3   : > { %v401_v23 = vmul.f32 1.442695, %v400_v22 }
 0x1e5   : > { %625 = vpow2.f32 %v401_v23 }
 0x1ef   : > { %v626_v24 = vpop.eup %625 }
 0x1f0   : > { %v403_v25 = vsel %vm392_vm1, %v626_v24, 0.0 }
 0x1f1   : > { %v404_v26 = vrot.slane %v403_v25, 4 }
 0x1f3   : > { %v405_v28 = vadd.f32 %v404_v26, %v403_v25 }
 0x1f5   : > { %v406_v29 = vrot.slane %v405_v28, 2 }
 0x1f7   : > { %v407_v30 = vadd.f32 %v406_v29, %v405_v28 }
 0x1f9   : > { %v408_v31 = vrot.slane %v407_v30, 1 }
 0x1fb   : > { %v409_v32 = vadd.f32 %v408_v31, %v407_v30 }
 0x1fd   : > { %627 = vrcp.f32 %v409_v32 }
 0x207   : > { %v628_v33 = vpop.eup %627 }
 0x208   : > { %v411_v34 = vmul.f32 %v628_v33, %v626_v24 }
 0x20a   : > { %414 = vperm.xlu0 %620, %v411_v34  }
 0x289   : > { %v415_v35 = vpop.permute.xlu0 %414 }
 0x28a   : > { %v417_v36 = vmul.f32 %v415_v35, %v828_v27 }
 0x28c   : > { %v418_v37 = vsel %vm213_vm0, %v417_v36, 0.0 }
 0x28d   : > { %v419_v38 = vrot.slane %v418_v37, 4 }
 0x28f   : > { %v420_v39 = vadd.f32 %v419_v38, %v418_v37 }
 0x291   : > { %v421_v40 = vrot.slane %v420_v39, 2 }
 0x293   : > { %v422_v41 = vadd.f32 %v421_v40, %v420_v39 }
 0x295   : > { %v423_v42 = vrot.slane %v422_v41, 1 }
 0x297   : > { %v424_v43 = vadd.f32 %v423_v42, %v422_v41 }
 0x299   : > { %426 = vst.msk [vmem:[%s187_s5] sm:$0x1] %vm425_vm2, %v424_v43 }
 0x29a   : > { %642 = shalt.err (!%p639_p3)
}
 0x29b   : > { %s643_s14 = scalar_lea.hbm %s908_s9, 16  ;;  %s647_s27 = scalar_lea.hbm %s954_s4, 32 }
 0x29c   : > { %p644_p4 = scmp.ne.s32.totalorder %s908_s9, %s643_s14  ;;  %p648_p9 = scmp.lt.u32.totalorder %s908_s9, %s954_s4 }
 0x29d   : > { %p649_p10 = scmp.lt.u32.totalorder %s647_s27, %s643_s14  ;;  %p651_p12 = scmp.lt.u32.totalorder %s643_s14, %s908_s9 }
 0x29e   : > { %p645_p7 = pnand %p644_p4, %p759_p5 }
 0x29f   : > { %p650_p11 = por %p649_p10, %p648_p9 }
 0x2a0   : > { %p646_p8 = pneg %p645_p7 }
 0x2a1   : > { %p652_p13 = por %p651_p12, %p650_p11 }
 0x2a3   : > { %p653_p0 = pnand %p652_p13, %p646_p8 }
 0x2a5   : > { %656 = shalt.err (!%p653_p0)
}
 0x2a6   : > { %579 = dma.vmem_to_hbm [thread:$0]  (%p759_p5), %s910_s6, 16, %s908_s9, %s428_s10  }
 0x2a7 PF: > { %p585_p1 = scmp.ge.s32.totalorder %s691_s18, 2  ;;  %s452_s29 = sand.u32 1, %s679_s15  }
 0x2a8   : > { %s453_s30 = scalar_lea.sflag [#allocation3], %s452_s29 }
 0x2a9   : > { %p582_p2 = pnand %p585_p1, %p763_p6 }
 0x2ab   : > { %674 = dma.done.wait (!%p582_p2), %s453_s30, 16  }
 0x2ac   : > { %676 = vsyncadd (!%p582_p2), %s453_s30, 4294967280  ;;  %p14_p3 = scmp.ge.s32.totalorder %s746_s21, 4   ;;  %s957_s15 = smov %s683_s16 }
 0x2ad   : > { %s958_s16 = smov %s687_s17  ;;  %s959_s17 = smov %s757_s24 }
 0x2ae   : > { %s960_s18 = smov %s746_s21  ;;  %16 = sbr.rel (!%p14_p3) target bundleno = 3 (0x3), region = 71 }
 0x2b5   :  { %457 = vsyncpa [#allocation3], 1 }
 0x2b6   :  { %459 = vsyncpa [#allocation3 + $0x1], 1 }

</bundles_post_ra>
